<compile_context>
chip_gen: v7x
topology: tpu7x:2x2x1
jax: 0.10.0
libtpu: 0.0.40
codegen_flags: <defaults>
</compile_context>

<pallas_src>
import jax
import jax.numpy as jnp
from jax.experimental import pallas as pl
from jax.experimental.pallas import tpu as pltpu

EPS = 1e-8  # F.cosine_similarity default eps


def classifier_kernel(x_ref, w1x_ref, m_ref, b1_ref, w2_ref, b2_ref, out_ref):
    x = x_ref[...]                                                    # (TB, D) f32

    # 1 / max(||x||, eps) == rsqrt(max(sum(x*x), eps^2))  -> EUP, no divide.
    inv_xnorm = jax.lax.rsqrt(
        jnp.maximum(jnp.sum(x * x, axis=-1, keepdims=True), EPS * EPS))  # (TB, 1)

    # bf16 x bf16 matmuls with f32 accumulation (single-pass MXU path; no
    # per-step weight up-cast).
    x_bf = x.astype(jnp.bfloat16)
    y_x = jnp.dot(x_bf, w1x_ref[...], preferred_element_type=jnp.float32)  # (TB, H)
    y_s = jnp.dot(x_bf, m_ref[...], preferred_element_type=jnp.float32)    # (TB, H)

    h = jnp.maximum(y_x + y_s * inv_xnorm + b1_ref[...], 0.0)              # ReLU, f32
    h_bf = h.astype(jnp.bfloat16)

    out = jnp.dot(h_bf, w2_ref[...], preferred_element_type=jnp.float32) + b2_ref[...]
    out_ref[...] = out.astype(out_ref.dtype)   # bf16 writeback, lane-dense 128 tile


def _round_up(n, m):
    return ((n + m - 1) // m) * m


def simple_classifier_with_similarity(x, class_embs, w1, b1, w2, b2, *, block_b=512):
    """x: (B, D); class_embs: (3, D); w1: (D+3, 512); b1: (512,); w2: (512, C); b2: (C,)."""
    B, D = x.shape
    H = w1.shape[1]
    C = w2.shape[1]

    # ---- wrapper-side algebraic fold of the cosine-similarity branch ----
    e_norm = jnp.sqrt(jnp.sum(class_embs * class_embs, axis=-1, keepdims=True))  # (3, 1)
    e_hat = class_embs / jnp.maximum(e_norm, EPS)                                # (3, D)
    w1_x = w1[:D, :].astype(jnp.bfloat16)                                        # (D, H)
    m = jnp.dot(e_hat.T, w1[D:, :]).astype(jnp.bfloat16)                         # (D, H)

    # ---- lane-dense padded layer-2 output (CP multiple of 128 lanes) ----
    CP = max(128, _round_up(C, 128))
    w2p = jnp.zeros((H, CP), jnp.float32).at[:, :C].set(w2).astype(jnp.bfloat16)
    b2p = jnp.zeros((1, CP), jnp.float32).at[0, :C].set(b2)
    b1_2d = b1.reshape(1, H).astype(jnp.float32)

    # ---- batch tiling: big tiles amortize the ~0.35us/step pipeline overhead;
    #      clamp so grid >= 2 steps -> both v7x TensorCores get work. 16-row
    #      alignment keeps bf16 output blocks on native sublane tiling.
    B16 = _round_up(B, 16)
    TB = min(block_b, max(16, _round_up(pl.cdiv(B16, 2), 16)))
    Bp = _round_up(B16, TB)
    xp = x if Bp == B else jnp.pad(x, ((0, Bp - B), (0, 0)))
    grid = (Bp // TB,)

    cost = pl.CostEstimate(
        flops=2 * Bp * D * (2 * H) + 2 * Bp * H * CP,
        transcendentals=Bp,
        bytes_accessed=(Bp * D * 4            # x (f32)
                        + 2 * D * H * 2       # layer-1 weights (bf16)
                        + H * 4 + CP * 4      # biases
                        + H * CP * 2          # layer-2 weights (bf16)
                        + Bp * CP * 2),       # output (bf16)
    )

    # Resident operands (constant index_map): keep them single-buffered.
    res = dict(pipeline_mode=pl.Buffered(buffer_count=1))

    out = pl.pallas_call(
        classifier_kernel,
        out_shape=jax.ShapeDtypeStruct((Bp, CP), jnp.bfloat16),
        grid=grid,
        in_specs=[
            pl.BlockSpec((TB, D), lambda i: (i, 0)),             # x tile (pipelined)
            pl.BlockSpec((D, H), lambda i: (0, 0), **res),       # layer-1 weights on x
            pl.BlockSpec((D, H), lambda i: (0, 0), **res),       # folded similarity weights
            pl.BlockSpec((1, H), lambda i: (0, 0), **res),       # b1
            pl.BlockSpec((H, CP), lambda i: (0, 0), **res),      # padded layer-2 weights
            pl.BlockSpec((1, CP), lambda i: (0, 0), **res),      # padded b2
        ],
        out_specs=pl.BlockSpec((TB, CP), lambda i: (i, 0)),
        compiler_params=pltpu.CompilerParams(dimension_semantics=("parallel",)),
        cost_estimate=cost,
    )(xp, w1_x, m, b1_2d, w2p, b2p)

    return out[:B, :C].astype(jnp.float32)


def reference_forward(x, class_embs, w1, b1, w2, b2):
    """Pure-JAX f32 reference mirroring the PyTorch module semantics."""
    x_norm = jnp.linalg.norm(x, axis=-1, keepdims=True)
    sims = []
    for i in range(3):
        e = class_embs[i:i + 1]                                   # (1, D)
        e_norm = jnp.linalg.norm(e, axis=-1, keepdims=True)
        s = jnp.sum(x * e, axis=-1, keepdims=True) / (
            jnp.maximum(x_norm, EPS) * jnp.maximum(e_norm, EPS))
        sims.append(s)
    xc = jnp.concatenate([x] + sims, axis=1)
    h = jnp.maximum(xc @ w1 + b1, 0.0)
    return h @ w2 + b2


if __name__ == "__main__":
    B, D, H, C = 8, 32, 512, 10   # batch, embedding_dim, hidden(=512 per module), num_classes

    key = jax.random.PRNGKey(0)
    keys = jax.random.split(key, 6)

    x = jax.random.normal(keys[0], (B, D), dtype=jnp.float32)
    class_embs = jax.random.normal(keys[1], (3, D), dtype=jnp.float32)

    # Parameters stored as (in_features, out_features); match nn.Linear(D+3, 512) / (512, C).
    w1 = jax.random.normal(keys[2], (D + 3, H), dtype=jnp.float32) * 0.05
    b1 = jax.random.normal(keys[3], (H,), dtype=jnp.float32) * 0.01
    w2 = jax.random.normal(keys[4], (H, C), dtype=jnp.float32) * 0.05
    b2 = jax.random.normal(keys[5], (C,), dtype=jnp.float32) * 0.01

    out = simple_classifier_with_similarity(x, class_embs, w1, b1, w2, b2)
    out = jax.block_until_ready(out)

    ref = reference_forward(x, class_embs, w1, b1, w2, b2)
    assert out.shape == (B, C)
    # Tolerance accounts for bf16 weights / activations / output writeback with
    # f32 accumulation (observed error ~1e-3, bound well under 2e-2).
    assert jnp.allclose(out, ref, atol=2e-2, rtol=2e-2), "mismatch vs JAX reference"

    print("KERNEL_OK")
</pallas_src>

<mosaic_0001>
module attributes {stable_mosaic.version = 11 : i64} {
  func.func @classifier_kernel(%arg0: i32, %arg1: memref<16x32xf32, #tpu.memory_space<vmem>>, %arg2: memref<32x512xbf16, #tpu.memory_space<vmem>>, %arg3: memref<32x512xbf16, #tpu.memory_space<vmem>>, %arg4: memref<1x512xf32, #tpu.memory_space<vmem>>, %arg5: memref<512x128xbf16, #tpu.memory_space<vmem>>, %arg6: memref<1x128xf32, #tpu.memory_space<vmem>>, %arg7: memref<16x128xbf16, #tpu.memory_space<vmem>>) attributes {dimension_semantics = [#tpu.dimension_semantics<parallel>], iteration_bounds = array<i64: 1>, scalar_prefetch = 0 : i64, scratch_operands = 0 : i64, tpu.core_type = #tpu.core_type<tc>, window_params = [{transform_indices = @transform_0, window_bounds = array<i64: 16, 32>}, {pipeline_mode = #tpu.pipeline_mode<synchronous>, transform_indices = @transform_1, window_bounds = array<i64: 32, 512>}, {pipeline_mode = #tpu.pipeline_mode<synchronous>, transform_indices = @transform_2, window_bounds = array<i64: 32, 512>}, {pipeline_mode = #tpu.pipeline_mode<synchronous>, transform_indices = @transform_3, window_bounds = array<i64: 1, 512>}, {pipeline_mode = #tpu.pipeline_mode<synchronous>, transform_indices = @transform_4, window_bounds = array<i64: 512, 128>}, {pipeline_mode = #tpu.pipeline_mode<synchronous>, transform_indices = @transform_5, window_bounds = array<i64: 1, 128>}, {transform_indices = @transform_6, window_bounds = array<i64: 16, 128>}]} {
    %c0 = arith.constant 0 : index
    %c0_0 = arith.constant 0 : index
    %0 = vector.load %arg1[%c0, %c0_0] : memref<16x32xf32, #tpu.memory_space<vmem>>, vector<16x32xf32>
    %1 = arith.mulf %0, %0 : vector<16x32xf32>
    %cst = arith.constant dense<0.000000e+00> : vector<16xf32>
    %2 = vector.multi_reduction <add>, %1, %cst [1] : vector<16x32xf32> to vector<16xf32>
    %3 = vector.shape_cast %2 : vector<16xf32> to vector<16x1xf32>
    %cst_1 = arith.constant 1.000000e-16 : f32
    %4 = vector.broadcast %cst_1 : f32 to vector<16x1xf32>
    %5 = arith.maximumf %3, %4 : vector<16x1xf32>
    %6 = math.rsqrt %5 : vector<16x1xf32>
    %7 = arith.truncf %0 : vector<16x32xf32> to vector<16x32xbf16>
    %c0_2 = arith.constant 0 : index
    %c0_3 = arith.constant 0 : index
    %8 = vector.load %arg2[%c0_2, %c0_3] : memref<32x512xbf16, #tpu.memory_space<vmem>>, vector<32x512xbf16>
    %cst_4 = arith.constant dense<0.000000e+00> : vector<16x512xf32>
    %9 = tpu.matmul %7, %8, %cst_4 {dimension_numbers = #tpu.dot_dimension_numbers<[1], [0], [0], [1], [0, 0, 1, 1], [], []>} : vector<16x32xbf16>, vector<32x512xbf16>, vector<16x512xf32> -> vector<16x512xf32>
    %c0_5 = arith.constant 0 : index
    %c0_6 = arith.constant 0 : index
    %10 = vector.load %arg3[%c0_5, %c0_6] : memref<32x512xbf16, #tpu.memory_space<vmem>>, vector<32x512xbf16>
    %cst_7 = arith.constant dense<0.000000e+00> : vector<16x512xf32>
    %11 = tpu.matmul %7, %10, %cst_7 {dimension_numbers = #tpu.dot_dimension_numbers<[1], [0], [0], [1], [0, 0, 1, 1], [], []>} : vector<16x32xbf16>, vector<32x512xbf16>, vector<16x512xf32> -> vector<16x512xf32>
    %12 = vector.broadcast %6 : vector<16x1xf32> to vector<16x512xf32>
    %13 = arith.mulf %11, %12 : vector<16x512xf32>
    %14 = arith.addf %9, %13 : vector<16x512xf32>
    %c0_8 = arith.constant 0 : index
    %c0_9 = arith.constant 0 : index
    %15 = vector.load %arg4[%c0_8, %c0_9] : memref<1x512xf32, #tpu.memory_space<vmem>>, vector<1x512xf32>
    %16 = vector.broadcast %15 : vector<1x512xf32> to vector<16x512xf32>
    %17 = arith.addf %14, %16 : vector<16x512xf32>
    %cst_10 = arith.constant 0.000000e+00 : f32
    %18 = vector.broadcast %cst_10 : f32 to vector<16x512xf32>
    %19 = arith.maximumf %17, %18 : vector<16x512xf32>
    %20 = arith.truncf %19 : vector<16x512xf32> to vector<16x512xbf16>
    %c0_11 = arith.constant 0 : index
    %c0_12 = arith.constant 0 : index
    %21 = vector.load %arg5[%c0_11, %c0_12] : memref<512x128xbf16, #tpu.memory_space<vmem>>, vector<512x128xbf16>
    %cst_13 = arith.constant dense<0.000000e+00> : vector<16x128xf32>
    %22 = tpu.matmul %20, %21, %cst_13 {dimension_numbers = #tpu.dot_dimension_numbers<[1], [0], [0], [1], [0, 0, 1, 1], [], []>} : vector<16x512xbf16>, vector<512x128xbf16>, vector<16x128xf32> -> vector<16x128xf32>
    %c0_14 = arith.constant 0 : index
    %c0_15 = arith.constant 0 : index
    %23 = vector.load %arg6[%c0_14, %c0_15] : memref<1x128xf32, #tpu.memory_space<vmem>>, vector<1x128xf32>
    %24 = vector.broadcast %23 : vector<1x128xf32> to vector<16x128xf32>
    %25 = arith.addf %22, %24 : vector<16x128xf32>
    %26 = arith.truncf %25 : vector<16x128xf32> to vector<16x128xbf16>
    %c0_16 = arith.constant 0 : index
    %c0_17 = arith.constant 0 : index
    %27 = vector.load %arg7[%c0_16, %c0_17] : memref<16x128xbf16, #tpu.memory_space<vmem>>, vector<16x128xbf16>
    tpu.vector_store %arg7[%c0_16, %c0_17], %26 {strides = array<i32>} : memref<16x128xbf16, #tpu.memory_space<vmem>>, vector<16x128xbf16>,
    return
  }
  func.func @transform_0(%arg0: i32) -> (i32, i32) {
    %c0_i32 = arith.constant 0 : i32
    %c0_i32_0 = arith.constant 0 : i32
    return %arg0, %c0_i32 : i32, i32
  }
  func.func @transform_1(%arg0: i32) -> (i32, i32) {
    %c0_i32 = arith.constant 0 : i32
    %c0_i32_0 = arith.constant 0 : i32
    %c0_i32_1 = arith.constant 0 : i32
    return %c0_i32, %c0_i32_0 : i32, i32
  }
  func.func @transform_2(%arg0: i32) -> (i32, i32) {
    %c0_i32 = arith.constant 0 : i32
    %c0_i32_0 = arith.constant 0 : i32
    %c0_i32_1 = arith.constant 0 : i32
    return %c0_i32, %c0_i32_0 : i32, i32
  }
  func.func @transform_3(%arg0: i32) -> (i32, i32) {
    %c0_i32 = arith.constant 0 : i32
    %c0_i32_0 = arith.constant 0 : i32
    %c0_i32_1 = arith.constant 0 : i32
    return %c0_i32, %c0_i32_0 : i32, i32
  }
  func.func @transform_4(%arg0: i32) -> (i32, i32) {
    %c0_i32 = arith.constant 0 : i32
    %c0_i32_0 = arith.constant 0 : i32
    %c0_i32_1 = arith.constant 0 : i32
    return %c0_i32, %c0_i32_0 : i32, i32
  }
  func.func @transform_5(%arg0: i32) -> (i32, i32) {
    %c0_i32 = arith.constant 0 : i32
    %c0_i32_0 = arith.constant 0 : i32
    %c0_i32_1 = arith.constant 0 : i32
    return %c0_i32, %c0_i32_0 : i32, i32
  }
  func.func @transform_6(%arg0: i32) -> (i32, i32) {
    %c0_i32 = arith.constant 0 : i32
    %c0_i32_0 = arith.constant 0 : i32
    return %arg0, %c0_i32 : i32, i32
  }
}

</mosaic_0001>

<bundles_post_ra>
// kernel: tpu_custom_call.1
= control target key start
LH: loop header
LB: loop body
LE: loop exit
PB: predicated region body
PF: predicated region fallthrough
CT: control target
= control target key end

     0   :  { %11 = vsyncpa [#allocation3], 0  ;;  %s1225_s0 = inlined_call_operand.hbm [shape: f32[16,32], index: 0, kind: input, shape index: {}]   ;;  %s1226_s1 = inlined_call_operand.hbm [shape: bf16[32,512], index: 1, kind: input, shape index: {}]   ;;  %s1227_s2 = inlined_call_operand.hbm [shape: bf16[32,512], index: 2, kind: input, shape index: {}]   ;;  %s1228_s3 = inlined_call_operand.vmem [shape: f32[1,512], index: 3, kind: input, shape index: {}]   ;;  %s1229_s4 = inlined_call_operand.hbm [shape: bf16[512,128], index: 4, kind: input, shape index: {}]   ;;  %s1230_s5 = inlined_call_operand.vmem [shape: f32[1,128], index: 5, kind: input, shape index: {}]   ;;  %s1231_s6 = inlined_call_operand.hbm [shape: bf16[16,128], index: 6, kind: output, shape index: {}]  }
   0x1   :  { %12 = vsyncpa [#allocation6], 0 }
   0x2   :  { %13 = vsyncpa [#allocation9], 0 }
   0x3   :  { %14 = vsyncpa [#allocation4], 0  ;;  %s1087_s21 = smov [#allocation5]   ;;  %s969_s25 = scalar_lea.hbm %s1226_s1, 1024 }
   0x4   :  { %s32_s22 = sshll.u32 %s1087_s21, 4  ;;  %p970_p0 = scmp.ne.s32.totalorder %s1226_s1, %s969_s25  ;;  %s33_s22 = int_to_ptr.vmem [resolvable:$true] %s32_s22 }
   0x5   :  { %p973_p1 = scmp.lt.u32.totalorder %s969_s25, %s1226_s1 }
   0x7   :  { %p975_p2 = pnand %p973_p1, %p970_p0 }
   0x9   :  { %978 = shalt.err (!%p975_p2)
}
   0xa   :  { %s979_s30 = scalar_lea.vmem %s33_s22, 1024  ;;  %p984_p4 = scmp.lt.s32.totalorder %s33_s22, %s33_s22 }
   0xb   :  { %p980_p3 = scmp.ne.s32.totalorder %s33_s22, %s979_s30  ;;  %p985_p5 = scmp.lt.s32.totalorder %s979_s30, %s979_s30 }
   0xd   :  { %p986_p6 = por %p985_p5, %p984_p4 }
   0xf   :  { %p987_p7 = pnand %p986_p6, %p980_p3 }
  0x11   :  { %990 = shalt.err (!%p987_p7)
}
  0x12   :  { %s1088_s7 = smov 256   ;;  %s1089_s8 = smov 16  }
  0x13   :  { %38 = dma.hbm_to_vmem [thread:$0]  %s1226_s1, 1024, %s33_s22, [#allocation6], %s1088_s7, %s1088_s7, %s1089_s8  }
  0x14   :  { %s1090_s11 = smov [#allocation2]   ;;  %s991_s15 = scalar_lea.hbm %s1225_s0, 256 }
  0x15   :  { %s20_s12 = sshll.u32 %s1090_s11, 4  ;;  %p992_p8 = scmp.ne.s32.totalorder %s1225_s0, %s991_s15  ;;  %s21_s12 = int_to_ptr.vmem [resolvable:$true] %s20_s12 }
  0x16   :  { %p995_p9 = scmp.lt.u32.totalorder %s991_s15, %s1225_s0 }
  0x18   :  { %p997_p10 = pnand %p995_p9, %p992_p8 }
  0x1a   :  { %1000 = shalt.err (!%p997_p10)
}
  0x1b   :  { %s1001_s20 = scalar_lea.vmem %s21_s12, 256  ;;  %p1006_p12 = scmp.lt.s32.totalorder %s21_s12, %s21_s12 }
  0x1c   :  { %p1002_p11 = scmp.ne.s32.totalorder %s21_s12, %s1001_s20  ;;  %p1007_p13 = scmp.lt.s32.totalorder %s1001_s20, %s1001_s20 }
  0x1e   :  { %p1008_p0 = por %p1007_p13, %p1006_p12 }
  0x20   :  { %p1009_p1 = pnand %p1008_p0, %p1002_p11 }
  0x22   :  { %1012 = shalt.err (!%p1009_p1)
}
  0x23   :  { %s1091_s1 = smov 128   ;;  %s1092_s21 = smov 8  }
  0x24   :  { %26 = dma.hbm_to_vmem [thread:$0]  %s1225_s0, 256, %s21_s12, [#allocation3], %s1091_s1, %s1091_s1, %s1092_s21  }
  0x25   :  { %s1093_s24 = smov [#allocation7]   ;;  %s1094_s26 = smov [#allocation8]  }
  0x26   :  { %s44_s25 = sshll.u32 %s1093_s24, 4  ;;  %s58_s27 = sshll.u32 %s1094_s26, 4  ;;  %s45_s25 = int_to_ptr.vmem [resolvable:$true] %s44_s25  ;;  %s1161_s27 = int_to_ptr.vmem [resolvable:$true] %s58_s27 }
  0x27   :  { %s1013_s30 = scalar_lea.hbm %s1227_s2, 1024 }
  0x28   :  { %p1014_p2 = scmp.ne.s32.totalorder %s1227_s2, %s1013_s30  ;;  %p1017_p3 = scmp.lt.u32.totalorder %s1013_s30, %s1227_s2 }
  0x2a   :  { %p1019_p4 = pnand %p1017_p3, %p1014_p2 }
  0x2c   :  { %1022 = shalt.err (!%p1019_p4)
}
  0x2d   :  { %s1023_s0 = scalar_lea.vmem %s45_s25, 1024  ;;  %p1028_p6 = scmp.lt.s32.totalorder %s45_s25, %s45_s25 }
  0x2e   :  { %p1024_p5 = scmp.ne.s32.totalorder %s45_s25, %s1023_s0  ;;  %p1029_p7 = scmp.lt.s32.totalorder %s1023_s0, %s1023_s0 }
  0x30   :  { %p1030_p8 = por %p1029_p7, %p1028_p6 }
  0x32   :  { %p1031_p9 = pnand %p1030_p8, %p1024_p5 }
  0x34   :  { %1034 = shalt.err (!%p1031_p9)
}
  0x35   :  { %50 = dma.hbm_to_vmem [thread:$0]  %s1227_s2, 1024, %s45_s25, [#allocation6], %s1088_s7, %s1088_s7, %s1089_s8  }
  0x36   :  { %s1035_s17 = scalar_lea.hbm %s1229_s4, 4096 }
  0x37   :  { %p1036_p10 = scmp.ne.s32.totalorder %s1229_s4, %s1035_s17  ;;  %p1039_p11 = scmp.lt.u32.totalorder %s1035_s17, %s1229_s4 }
  0x39   :  { %p1041_p12 = pnand %p1039_p11, %p1036_p10 }
  0x3b   :  { %1044 = shalt.err (!%p1041_p12)
}
  0x3c   :  { %s1045_s21 = scalar_lea.vmem %s1161_s27, 4096  ;;  %p1050_p0 = scmp.lt.s32.totalorder %s1161_s27, %s1161_s27 }
  0x3d   :  { %p1046_p13 = scmp.ne.s32.totalorder %s1161_s27, %s1045_s21  ;;  %p1051_p1 = scmp.lt.s32.totalorder %s1045_s21, %s1045_s21 }
  0x3f   :  { %p1052_p2 = por %p1051_p1, %p1050_p0 }
  0x41   :  { %p1053_p3 = pnand %p1052_p2, %p1046_p13 }
  0x43   :  { %1056 = shalt.err (!%p1053_p3)
}
  0x44   :  { %s1095_s2 = smov 64   ;;  %s1096_s7 = smov 4  }
  0x45   :  { %64 = dma.hbm_to_vmem [thread:$0]  %s1229_s4, 4096, %s1161_s27, [#allocation9], %s1095_s2, %s1095_s2, %s1096_s7  }
  0x46   :  { %1079 = dma.done.wait [#allocation3], 256  }
  0x47   :  { %1080 = vsyncadd [#allocation3], 4294967040 }
  0x48   :  { %1081 = dma.done.wait [#allocation6], 2048  }
  0x49   :  { %1082 = vsyncadd [#allocation6], 4294965248 }
  0x4a   :  { %1083 = dma.done.wait [#allocation9], 4096  }
  0x4b   :  { %1084 = vsyncadd [#allocation9], 4294963200  ;;  %v1097_v0 = vmov 0   ;;  %v909_v1 = vld [vmem:[#allocation7 + $0x4] ss:$16 sps:$4 sm:$0xff]   ;;  %v81_v10 = vld [vmem:[#allocation2 + $0x8] sm:$0xff]  ;;  %v377_v60 = vlaneseq }
  0x4c   :  { %187 = vmatprep.mubr.bf16.mxu0 %v1097_v0  ;;  %230 = vmatprep.mubr.bf16.mxu1 %v1097_v0  ;;  %v911_v2 = vld [vmem:[#allocation7 + $0xc] ss:$16 sps:$4 sm:$0xff]   ;;  %v913_v3 = vld [vmem:[#allocation7] ss:$16 sps:$4 sm:$0xff]   ;;  %v914_v4 = vld [vmem:[#allocation7 + $0x8] ss:$16 sps:$4 sm:$0xff]   ;;  %v83_v13 = vmul.f32 %v81_v10, %v81_v10 }
  0x4d   :  { %155 = vmatprep.subr.bf16.mxu0 %v909_v1  ;;  %198 = vmatprep.subr.bf16.mxu1 %v911_v2  ;;  %v915_v5 = vld [vmem:[#allocation7 + $0x24] ss:$16 sps:$4 sm:$0xff]   ;;  %v917_v6 = vld [vmem:[#allocation7 + $0x2c] ss:$16 sps:$4 sm:$0xff]   ;;  %v919_v7 = vld [vmem:[#allocation7 + $0x20] ss:$16 sps:$4 sm:$0xff]  }
  0x4e   :  { %156 = vmatpush1.bf16.msra.mxu0 %v913_v3  ;;  %199 = vmatpush1.bf16.msra.mxu1 %v914_v4  ;;  %v920_v8 = vld [vmem:[#allocation7 + $0x28] ss:$16 sps:$4 sm:$0xff]   ;;  %v80_v9 = vld [vmem:[#allocation2] sm:$0xff]  ;;  %vm84_vm0 = vcmask 261120   ;;  %v926_v17 = vld [vmem:[#allocation5 + $0xc] ss:$16 sps:$4 sm:$0xff]  }
  0x4f   :  { %157 = vmatprep.subr.bf16.mxu0 %v915_v5  ;;  %200 = vmatprep.subr.bf16.mxu1 %v917_v6  ;;  %v921_v11 = vld [vmem:[#allocation5] ss:$16 sps:$4 sm:$0xff]   ;;  %v82_v12 = vmul.f32 %v80_v9, %v80_v9  ;;  %v95_v14 = vpack.c.bf16 %v81_v10, %v80_v9  ;;  %v923_v15 = vld [vmem:[#allocation5 + $0x4] ss:$16 sps:$4 sm:$0xff]   ;;  %v924_v16 = vld [vmem:[#allocation5 + $0x8] ss:$16 sps:$4 sm:$0xff]  }
  0x50   :  { %v929_v19 = vld [vmem:[#allocation5 + $0x24] ss:$16 sps:$4 sm:$0xff]   ;;  %v927_v20 = vld [vmem:[#allocation5 + $0x20] ss:$16 sps:$4 sm:$0xff]   ;;  %v930_v21 = vld [vmem:[#allocation5 + $0x28] ss:$16 sps:$4 sm:$0xff]  }
  0x51   :  { %v85_v18 = vsel %vm84_vm0, %v82_v12, 0.0  ;;  %v88_v22 = vsel %vm84_vm0, %v83_v13, 0.0  ;;  %v932_v23 = vld [vmem:[#allocation5 + $0x2c] ss:$16 sps:$4 sm:$0xff]   ;;  %v933_v24 = vld [vmem:[#allocation8 + $0x40] sm:$0xff]   ;;  %v941_v32 = vld [vmem:[#allocation8 + $0x50] sm:$0xff]  }
  0x52   :  { %158 = vmatpush1.bf16.msra.mxu0 %v919_v7  ;;  %201 = vmatpush1.bf16.msra.mxu1 %v920_v8  ;;  %v934_v25 = vld [vmem:[#allocation8 + $0xc0] sm:$0xff]   ;;  %v937_v28 = vld [vmem:[#allocation8 + $0x48] sm:$0xff]   ;;  %v942_v33 = vld [vmem:[#allocation8 + $0xd0] sm:$0xff]   ;;  %v378_v61 = vshrl.u32 %v377_v60, 7  ;;  %s1098_s25 = smov [#allocation10]  }
  0x53   :  { %289 = vmatprep.subr.bf16.mxu0 %v923_v15  ;;  %86 = vadd.xlane.f32.xlu0 %v85_v18  ;;  %v935_v26 = vld [vmem:[#allocation8] sm:$0xff]   ;;  %v938_v29 = vld [vmem:[#allocation8 + $0xc8] sm:$0xff]   ;;  %v943_v34 = vld [vmem:[#allocation8 + $0x10] sm:$0xff]   ;;  %s777_s26 = sshll.u32 %s1098_s25, 4  ;;  %s778_s26 = int_to_ptr.vmem [resolvable:$true] %s777_s26 }
  0x54   :  { %332 = vmatprep.subr.bf16.mxu1 %v926_v17  ;;  %v936_v27 = vld [vmem:[#allocation8 + $0x80] sm:$0xff]   ;;  %v939_v30 = vld [vmem:[#allocation8 + $0x8] sm:$0xff]   ;;  %v944_v35 = vld [vmem:[#allocation8 + $0x90] sm:$0xff]   ;;  %v379_v6 = vsub.s32 0, %v378_v61  ;;  %v387_v7 = vsub.s32 2, %v378_v61  ;;  %v383_v10 = vsub.s32 1, %v378_v61  ;;  %p1062_p5 = scmp.lt.s32.totalorder %s778_s26, %s778_s26 }
  0x55   :  { %799 = vmatmul.mubr.msk.bf16.vlgmr.msra.gmra.mrb[0].mxu0 %vm84_vm0, %v95_v14  ;;  %800 = vmatmul.mubr.msk.bf16.vlgmr.msra.gmra.mrb[0].mxu1 %vm84_vm0, %v95_v14  ;;  %v940_v31 = vld [vmem:[#allocation8 + $0x88] sm:$0xff]   ;;  %v945_v36 = vld [vmem:[#allocation8 + $0x58] sm:$0xff]   ;;  %v949_v40 = vld [vmem:[#allocation8 + $0x60] sm:$0xff]  }
  0x56   :  { %290 = vmatpush1.bf16.msra.mxu0 %v921_v11  ;;  %333 = vmatpush1.bf16.msra.mxu1 %v924_v16  ;;  %v946_v37 = vld [vmem:[#allocation8 + $0xd8] sm:$0xff]   ;;  %v950_v41 = vld [vmem:[#allocation8 + $0xe0] sm:$0xff]   ;;  %v953_v44 = vld [vmem:[#allocation8 + $0x68] sm:$0xff]   ;;  %v391_v11 = vsub.s32 3, %v378_v61 }
  0x57   :  { %291 = vmatprep.subr.bf16.mxu0 %v929_v19  ;;  %334 = vmatprep.subr.bf16.mxu1 %v932_v23  ;;  %v947_v38 = vld [vmem:[#allocation8 + $0x18] sm:$0xff]   ;;  %v951_v42 = vld [vmem:[#allocation8 + $0x20] sm:$0xff]   ;;  %v954_v45 = vld [vmem:[#allocation8 + $0xe8] sm:$0xff]  }
  0x58   :  { %321 = vmatprep.mubr.bf16.mxu0 %v1097_v0  ;;  %364 = vmatprep.mubr.bf16.mxu1 %v1097_v0  ;;  %v948_v39 = vld [vmem:[#allocation8 + $0x98] sm:$0xff]   ;;  %v952_v43 = vld [vmem:[#allocation8 + $0xa0] sm:$0xff]   ;;  %v955_v46 = vld [vmem:[#allocation8 + $0x28] sm:$0xff]  }
  0x59   :  { %89 = vadd.xlane.f32.xlu0 %v88_v22  ;;  %v956_v47 = vld [vmem:[#allocation8 + $0xa8] sm:$0xff]   ;;  %v957_v48 = vld [vmem:[#allocation8 + $0x70] sm:$0xff]   ;;  %v961_v52 = vld [vmem:[#allocation8 + $0x78] sm:$0xff]  }
  0x5a   :  { %292 = vmatpush1.bf16.msra.mxu0 %v927_v20  ;;  %335 = vmatpush1.bf16.msra.mxu1 %v930_v21  ;;  %v958_v49 = vld [vmem:[#allocation8 + $0xf0] sm:$0xff]   ;;  %v962_v53 = vld [vmem:[#allocation8 + $0xf8] sm:$0xff]  }
  0x5b   :  { %853 = vmatprep.subr.bf16.mxu0 %v933_v24  ;;  %875 = vmatprep.subr.bf16.mxu1 %v934_v25  ;;  %v959_v50 = vld [vmem:[#allocation8 + $0x30] sm:$0xff]   ;;  %v963_v54 = vld [vmem:[#allocation8 + $0x38] sm:$0xff]  }
  0x5c   :  { %v960_v51 = vld [vmem:[#allocation8 + $0xb0] sm:$0xff]   ;;  %v964_v55 = vld [vmem:[#allocation8 + $0xb8] sm:$0xff]  }
  0x5d   :  { %809 = vmatmul.mubr.msk.bf16.vlgmr.msra.gmra.mrb[4].mxu0 %vm84_vm0, %v95_v14  ;;  %810 = vmatmul.mubr.msk.bf16.vlgmr.msra.gmra.mrb[4].mxu1 %vm84_vm0, %v95_v14  ;;  %v375_v9 = vld [vmem:[%s1228_s3] sm:$0xf] }
  0x5e   :  { %854 = vmatpush3.bf16.msra.mxu0 %v935_v26  ;;  %876 = vmatpush3.bf16.msra.mxu1 %v936_v27  ;;  %v380_v15 = vrot.slane %v375_v9, %v379_v6  ;;  %v388_v16 = vrot.slane %v375_v9, %v387_v7  ;;  %v384_v21 = vrot.slane %v375_v9, %v383_v10 }
  0x5f   :  { %855 = vmatprep.subr.bf16.mxu0 %v937_v28  ;;  %877 = vmatprep.subr.bf16.mxu1 %v938_v29  ;;  %v392_v22 = vrot.slane %v375_v9, %v391_v11 }
  0x62   :  { %856 = vmatpush3.bf16.msra.mxu0 %v939_v30  ;;  %878 = vmatpush3.bf16.msra.mxu1 %v940_v31 }
  0x63   :  { %857 = vmatprep.subr.bf16.mxu0 %v941_v32  ;;  %879 = vmatprep.subr.bf16.mxu1 %v942_v33 }
  0x66   :  { %858 = vmatpush3.bf16.msra.mxu0 %v943_v34  ;;  %880 = vmatpush3.bf16.msra.mxu1 %v944_v35 }
  0x67   :  { %859 = vmatprep.subr.bf16.mxu0 %v945_v36  ;;  %881 = vmatprep.subr.bf16.mxu1 %v946_v37 }
  0x6a   :  { %860 = vmatpush3.bf16.msra.mxu0 %v947_v38  ;;  %882 = vmatpush3.bf16.msra.mxu1 %v948_v39 }
  0x6b   :  { %861 = vmatprep.subr.bf16.mxu0 %v949_v40  ;;  %883 = vmatprep.subr.bf16.mxu1 %v950_v41 }
  0x6e   :  { %862 = vmatpush3.bf16.msra.mxu0 %v951_v42  ;;  %884 = vmatpush3.bf16.msra.mxu1 %v952_v43 }
  0x6f   :  { %863 = vmatprep.subr.bf16.mxu0 %v953_v44  ;;  %885 = vmatprep.subr.bf16.mxu1 %v954_v45 }
  0x72   :  { %864 = vmatpush3.bf16.msra.mxu0 %v955_v46  ;;  %886 = vmatpush3.bf16.msra.mxu1 %v956_v47 }
  0x73   :  { %865 = vmatprep.subr.bf16.mxu0 %v957_v48  ;;  %887 = vmatprep.subr.bf16.mxu1 %v958_v49 }
  0x76   :  { %866 = vmatpush3.bf16.msra.mxu0 %v959_v50  ;;  %888 = vmatpush3.bf16.msra.mxu1 %v960_v51 }
  0x77   :  { %867 = vmatprep.subr.bf16.mxu0 %v961_v52  ;;  %889 = vmatprep.subr.bf16.mxu1 %v962_v53 }
  0x7a   :  { %868 = vmatpush3.bf16.msra.mxu0 %v963_v54  ;;  %890 = vmatpush3.bf16.msra.mxu1 %v964_v55 }
  0xe0   :  { %v87_v56 = vpop.xlane.xlu0 %86 }
  0xe1   :  { %v91_v58 = vmax.f32 %v87_v56, 1e-16 }
  0xe3   :  { %965 = vrsqrt.f32 %v91_v58 }
  0xe6   :  { %v90_v57 = vpop.xlane.xlu0 %89 }
  0xe7   :  { %v92_v59 = vmax.f32 %v90_v57, 1e-16 }
  0xe9   :  { %967 = vrsqrt.f32 %v92_v59 }
  0xed   :  { %v966_v8 = vpop.eup %965 }
  0xf3   :  { %v968_v12 = vpop.eup %967 }
 0x128   :  { %v189_v62 = vpop.f32.mrb[0].mxu0  ;;  %v232_v63 = vpop.f32.mrb[0].mxu1 }
 0x129   :  { %v191_v0 = vpop.f32.mrb[1].mxu0  ;;  %v234_v1 = vpop.f32.mrb[1].mxu1  ;;  %v241_v13 = vmul.f32 %v966_v8, %v189_v62  ;;  %v243_v14 = vmul.f32 %v966_v8, %v232_v63  ;;  %v811_v63 = vld [vmem:[%s1230_s5] ss:$0 sm:$0xff]  ;;  %s1057_s5 = scalar_lea.vmem %s778_s26, 128 }
 0x12a   :  { %v193_v2 = vpop.f32.mrb[2].mxu0  ;;  %v236_v3 = vpop.f32.mrb[2].mxu1  ;;  %v242_v17 = vmul.f32 %v966_v8, %v191_v0  ;;  %v244_v18 = vmul.f32 %v966_v8, %v234_v1  ;;  %p1058_p4 = scmp.ne.s32.totalorder %s778_s26, %s1057_s5  ;;  %p1063_p6 = scmp.lt.s32.totalorder %s1057_s5, %s1057_s5 }
 0x12b   :  { %v195_v4 = vpop.f32.mrb[3].mxu0  ;;  %v238_v5 = vpop.f32.mrb[3].mxu1  ;;  %v245_v23 = vmul.f32 %v968_v12, %v193_v2  ;;  %v247_v24 = vmul.f32 %v968_v12, %v236_v3 }
 0x12c   :  { %v246_v29 = vmul.f32 %v968_v12, %v195_v4  ;;  %v248_v30 = vmul.f32 %v968_v12, %v238_v5  ;;  %p1064_p7 = por %p1063_p6, %p1062_p5 }
 0x12e   :  { %p1065_p8 = pnand %p1064_p7, %p1058_p4 }
 0x130   :  { %v323_v19 = vpop.f32.mrb[4].mxu0  ;;  %v366_v20 = vpop.f32.mrb[4].mxu1 }
 0x131   :  { %v324_v25 = vadd.f32 %v323_v19, %v241_v13  ;;  %v367_v26 = vadd.f32 %v366_v20, %v243_v14  ;;  %v325_v27 = vpop.f32.mrb[5].mxu0  ;;  %v368_v28 = vpop.f32.mrb[5].mxu1 }
 0x132   :  { %v326_v31 = vadd.f32 %v325_v27, %v242_v17  ;;  %v369_v32 = vadd.f32 %v368_v28, %v244_v18  ;;  %v327_v33 = vpop.f32.mrb[6].mxu0  ;;  %v370_v34 = vpop.f32.mrb[6].mxu1 }
 0x133   :  { %v397_v35 = vadd.f32 %v380_v15, %v324_v25  ;;  %v399_v36 = vadd.f32 %v388_v16, %v367_v26  ;;  %v328_v37 = vadd.f32 %v327_v33, %v245_v23  ;;  %v371_v38 = vadd.f32 %v370_v34, %v247_v24  ;;  %v329_v39 = vpop.f32.mrb[7].mxu0  ;;  %v372_v40 = vpop.f32.mrb[7].mxu1 }
 0x134   :  { %v398_v41 = vadd.f32 %v384_v21, %v326_v31  ;;  %v400_v42 = vadd.f32 %v392_v22, %v369_v32  ;;  %v330_v43 = vadd.f32 %v329_v39, %v246_v29  ;;  %v373_v44 = vadd.f32 %v372_v40, %v248_v30 }
 0x135   :  { %v401_v45 = vadd.f32 %v380_v15, %v328_v37  ;;  %v403_v46 = vadd.f32 %v388_v16, %v371_v38  ;;  %v405_v49 = vmax.f32 %v397_v35, 0.0  ;;  %v407_v50 = vmax.f32 %v399_v36, 0.0 }
 0x136   :  { %v402_v47 = vadd.f32 %v384_v21, %v330_v43  ;;  %v404_v48 = vadd.f32 %v392_v22, %v373_v44  ;;  %v406_v53 = vmax.f32 %v398_v41, 0.0  ;;  %v408_v54 = vmax.f32 %v400_v42, 0.0 }
 0x137   :  { %v409_v51 = vmax.f32 %v401_v45, 0.0  ;;  %v411_v52 = vmax.f32 %v403_v46, 0.0 }
 0x138   :  { %v410_v55 = vmax.f32 %v402_v47, 0.0  ;;  %v412_v56 = vmax.f32 %v404_v48, 0.0 }
 0x139   :  { %v413_v57 = vpack.c.bf16 %v409_v51, %v405_v49  ;;  %v415_v58 = vpack.c.bf16 %v411_v52, %v407_v50 }
 0x13a   :  { %v414_v59 = vpack.c.bf16 %v410_v55, %v406_v53  ;;  %v416_v60 = vpack.c.bf16 %v412_v56, %v408_v54 }
 0x13c   :  { %712 = vmatprep.mubr.bf16.mxu0 %v414_v59  ;;  %753 = vmatprep.mubr.bf16.mxu1 %v416_v60 }
 0x13d   :  { %713 = vmatmul.mubr.bf16.vlgmr.msra.gmra.mrb[8].mxu0 %v413_v57  ;;  %754 = vmatmul.mubr.bf16.vlgmr.msra.gmra.mrb[8].mxu1 %v415_v58 }
 0x210   :  { %v869_v61 = vpop.f32.mrb[8].mxu0  ;;  %v891_v62 = vpop.f32.mrb[8].mxu1 }
 0x211   :  { %v870_v0 = vpop.f32.mrb[9].mxu0  ;;  %v892_v1 = vpop.f32.mrb[9].mxu1 }
 0x212   :  { %v871_v2 = vadd.f32 %v870_v0, %v869_v61  ;;  %v893_v3 = vadd.f32 %v892_v1, %v891_v62  ;;  %v872_v4 = vpop.f32.mrb[10].mxu0  ;;  %v894_v5 = vpop.f32.mrb[10].mxu1 }
 0x213   :  { %v873_v6 = vpop.f32.mrb[11].mxu0  ;;  %v895_v7 = vpop.f32.mrb[11].mxu1 }
 0x214   :  { %v715_v8 = vadd.f32 %v871_v2, %v811_v63  ;;  %v874_v9 = vadd.f32 %v873_v6, %v872_v4  ;;  %v896_v10 = vadd.f32 %v895_v7, %v894_v5 }
 0x216   :  { %v756_v11 = vadd.f32 %v893_v3, %v715_v8  ;;  %v718_v12 = vadd.f32 %v874_v9, %v811_v63 }
 0x218   :  { %v759_v13 = vadd.f32 %v896_v10, %v718_v12 }
 0x21a   :  { %v851_v14 = vpack.c.bf16 %v759_v13, %v756_v11 }
 0x21c   :  { %852 = vst [vmem:[#allocation10] sm:$0xff] %v851_v14  }
 0x21d   :  { %1068 = shalt.err (!%p1065_p8)
}
 0x21e   :  { %s1069_s29 = scalar_lea.hbm %s1231_s6, 128 }
 0x21f   :  { %p1070_p9 = scmp.ne.s32.totalorder %s1231_s6, %s1069_s29  ;;  %p1073_p10 = scmp.lt.u32.totalorder %s1069_s29, %s1231_s6 }
 0x221   :  { %p1075_p11 = pnand %p1073_p10, %p1070_p9 }
 0x223   :  { %1078 = shalt.err (!%p1075_p11)
}
 0x224   :  { %783 = dma.vmem_to_hbm [thread:$0]  %s778_s26, 128, %s1231_s6, [#allocation4], %s1095_s2, %s1095_s2, %s1096_s7  }
 0x225   :  { %1085 = dma.done.wait [#allocation4], 128  }
 0x226   :  { %1086 = vsyncadd [#allocation4], 4294967168 }
 0x227   :  { %787 = vsyncpa [#allocation3], 1 }
 0x228   :  { %788 = vsyncpa [#allocation6], 1 }
 0x229   :  { %789 = vsyncpa [#allocation9], 1 }
 0x22a   :  { %790 = vsyncpa [#allocation4], 1 }

</bundles_post_ra>
